<compile_context>
chip_gen: v7x
topology: tpu7x:2x2x1
jax: 0.10.0
libtpu: 0.0.40
codegen_flags: <defaults>
</compile_context>

<pallas_src>
import math

import jax
import jax.numpy as jnp
from jax.experimental import pallas as pl
from jax.experimental.pallas import tpu as pltpu


# ---------------------------------------------------------------------------
# helpers
# ---------------------------------------------------------------------------
def _largest_divisor_leq(n, cap):
    cap = max(1, min(n, cap))
    for d in range(cap, 0, -1):
        if n % d == 0:
            return d
    return 1


def _eca_band_matrix(w_eca, C):
    """(C, C) banded matrix M with M[c, cp] = w_eca[cp - c + pad] inside the band.

    conv[c] = sum_cp M[c, cp] * mean[cp]  ==  Conv1d(1, 1, k, padding=pad)(mean).
    """
    k = w_eca.shape[0]
    pad = (k - 1) // 2
    ci = jnp.arange(C)
    diff = ci[None, :] - ci[:, None] + pad          # [c, cp] -> cp - c + pad
    w = w_eca.astype(jnp.float32)
    return jnp.where((diff >= 0) & (diff < k), w[jnp.clip(diff, 0, k - 1)], 0.0)


# ---------------------------------------------------------------------------
# kernels
# ---------------------------------------------------------------------------
def _fused_kernel(x_ref, band_ref, wsse_ref, o_ref):
    # x_ref/o_ref: (C, HW)  one batch element (batch dim squeezed by BlockSpec)
    # band_ref:    (C, C)   banded ECA conv matrix
    # wsse_ref:    (C, 1)   sSE 1x1-conv weights (column vector)
    x = x_ref[...].astype(jnp.float32)

    # --- cSE / ECA branch: global avg pool -> k-tap channel conv -> sigmoid
    mean = jnp.mean(x, axis=-1, keepdims=True)                               # (C, 1)
    conv = jnp.dot(band_ref[...], mean, preferred_element_type=jnp.float32)  # (C, 1)
    a = jax.nn.sigmoid(conv)                                                 # (C, 1)

    # --- sSE branch: 1x1 conv over channels as multiply + cross-sublane
    #     reduce (C is small; MXU would be wasted and this keeps full f32).
    q = jnp.sum(x * wsse_ref[...], axis=0, keepdims=True)                    # (1, HW)
    s = jax.nn.sigmoid(q)

    # --- combine: cSE(U) + sSE(U) = x*a + x*s = x*(a+s), one fused pass
    o_ref[...] = (x * (a + s)).astype(o_ref.dtype)


def _tiled_kernel(x_ref, a_ref, wsse_ref, o_ref):
    # x_ref:    (bt, C, T)  lane-dense tile of x
    # a_ref:    (bt, C, 1)  precomputed ECA channel gates (sigmoid applied)
    # wsse_ref: (1,  C, 1)  sSE 1x1-conv weights
    # o_ref:    (bt, C, T)
    x = x_ref[...].astype(jnp.float32)
    # sSE conv for the whole block: one batched multiply + sublane reduce.
    q = jnp.sum(x * wsse_ref[...], axis=1, keepdims=True)                    # (bt, 1, T)
    s = jax.nn.sigmoid(q)
    # Single fused elementwise combine over the whole (bt, C, T) block.
    o_ref[...] = (x * (a_ref[...] + s)).astype(o_ref.dtype)


# ---------------------------------------------------------------------------
# wrapper
# ---------------------------------------------------------------------------
def eca_scse_pallas(x, w_eca, w_sse, *,
                    out_dtype=None,
                    max_tile_bytes=4 * 1024 * 1024,     # v7x: 4-8 MiB; still fine on v5e/v6e
                    target_step_bytes=4 * 1024 * 1024,
                    fused_slab_bytes=3 * 1024 * 1024,   # per-batch slab limit for the fused path
                    vmem_limit_bytes=32 * 1024 * 1024,
                    force_two_pass=False):
    """ECA_scSE forward.  x: (B, C, H, W); w_eca: (k,); w_sse: (C,)."""
    B, C, H, W = x.shape
    HW = H * W
    out_dtype = x.dtype if out_dtype is None else out_dtype

    x_flat = x.reshape(B, C, HW)                 # metadata-only reshape, no copy
    band = _eca_band_matrix(w_eca, C)            # (C, C) f32, tiny
    itemsize = jnp.dtype(x.dtype).itemsize

    cost = pl.CostEstimate(
        flops=5 * B * C * HW,                    # sSE matvec + combine
        transcendentals=B * HW + B * C,          # sigmoids
        bytes_accessed=itemsize * B * C * HW + jnp.dtype(out_dtype).itemsize * B * C * HW)

    # ---------------- path 1: fused single pass ----------------------------
    if (not force_two_pass) and (C * HW * 4 <= fused_slab_bytes):
        w_col = w_sse.reshape(C, 1).astype(jnp.float32)
        out_flat = pl.pallas_call(
            _fused_kernel,
            out_shape=jax.ShapeDtypeStruct((B, C, HW), out_dtype),
            grid_spec=pltpu.PrefetchScalarGridSpec(
                num_scalar_prefetch=0,
                grid=(B,),
                in_specs=[
                    pl.BlockSpec((None, C, HW), lambda b: (b, 0, 0)),   # x slab
                    pl.BlockSpec((C, C), lambda b: (0, 0)),             # band (resident)
                    pl.BlockSpec((C, 1), lambda b: (0, 0)),             # w_sse (resident)
                ],
                out_specs=pl.BlockSpec((None, C, HW), lambda b: (b, 0, 0)),
            ),
            compiler_params=pltpu.CompilerParams(
                dimension_semantics=("parallel",),
                vmem_limit_bytes=vmem_limit_bytes),
            cost_estimate=cost,
        )(x_flat, band, w_col)
        return out_flat.reshape(B, C, H, W)

    # ---------------- path 2: two-pass tiled fallback -----------------------
    # Cheap O(B*C) pre-pass: per-(b,c) mean -> banded channel conv -> sigmoid.
    mean = jnp.mean(x_flat, axis=-1, dtype=jnp.float32)                      # (B, C)
    conv = jnp.einsum('bd,cd->bc', mean, band,
                      precision=jax.lax.Precision.HIGHEST)
    a_gate = jax.nn.sigmoid(conv)[:, :, None]                                # (B, C, 1) f32

    # Lane-dense HW tile: multiple of 128 that divides HW when possible.
    lane_bytes = 4 * C
    t_cap = max(128, (max_tile_bytes // lane_bytes) // 128 * 128)
    if HW <= t_cap:
        T = HW                         # block dim == full array dim: always legal
    else:
        T = 0
        for cand in range(t_cap, 127, -128):
            if HW % cand == 0:
                T = cand
                break
        if T == 0:
            # No multiple-of-128 divisor of HW <= t_cap: the last partial tile
            # relies on Pallas' masked boundary stores; OOB-read columns only
            # feed their own (discarded) output columns since every op here is
            # column-local.
            # TODO(synk): spot-check this masked-boundary config on hardware.
            T = t_cap
    n_t = pl.cdiv(HW, T)

    # Pack batch elements per step to amortize step overhead, but keep >= 2
    # grid steps when possible so both v7x TensorCores get work.
    tile_bytes = C * T * itemsize
    bt_cap = max(1, target_step_bytes // max(1, tile_bytes))
    if n_t == 1 and B >= 2:
        bt_cap = min(bt_cap, B // 2)
    bt = _largest_divisor_leq(B, bt_cap)

    w_col3 = w_sse.reshape(1, C, 1).astype(jnp.float32)

    out_flat = pl.pallas_call(
        _tiled_kernel,
        out_shape=jax.ShapeDtypeStruct((B, C, HW), out_dtype),
        grid_spec=pltpu.PrefetchScalarGridSpec(
            num_scalar_prefetch=0,
            grid=(B // bt, n_t),
            in_specs=[
                pl.BlockSpec((bt, C, T), lambda bg, t: (bg, 0, t)),
                pl.BlockSpec((bt, C, 1), lambda bg, t: (bg, 0, 0)),
                pl.BlockSpec((1, C, 1), lambda bg, t: (0, 0, 0)),
            ],
            out_specs=pl.BlockSpec((bt, C, T), lambda bg, t: (bg, 0, t)),
        ),
        compiler_params=pltpu.CompilerParams(
            dimension_semantics=("parallel", "parallel"),
            vmem_limit_bytes=vmem_limit_bytes),
        cost_estimate=cost,
    )(x_flat, a_gate, w_col3)

    return out_flat.reshape(B, C, H, W)


# ---------------------------------------------------------------------------
# pure-JAX reference (matches the PyTorch module; no matmuls -> full f32)
# ---------------------------------------------------------------------------
def eca_scse_reference(x, w_eca, w_sse):
    B, C, H, W = x.shape
    k = w_eca.shape[0]
    pad = (k - 1) // 2

    # cSE (ECA)
    mean = x.reshape(B, C, H * W).mean(axis=-1)                      # (B, C)
    mean_p = jnp.pad(mean, ((0, 0), (pad, pad)))
    conv = jnp.zeros_like(mean)
    for j in range(k):
        conv = conv + w_eca[j] * mean_p[:, j:j + C]
    a = jax.nn.sigmoid(conv)[:, :, None, None]                       # (B, C, 1, 1)

    # sSE
    q = jnp.sum(x * w_sse[None, :, None, None], axis=1, keepdims=True)  # (B, 1, H, W)
    s = jax.nn.sigmoid(q)

    return x * a + x * s


if __name__ == "__main__":
    key = jax.random.PRNGKey(0)
    kx, ke, ks, kx2 = jax.random.split(key, 4)

    # ---- primary small problem (exercises the fused single-pass path) -----
    B, C, H, W = 2, 8, 16, 16
    t = int(abs(math.log(C, 2) + 1) / 2)
    k_size = t if t % 2 else t + 1                                   # C=8 -> k=3
    x = jax.random.normal(kx, (B, C, H, W), dtype=jnp.float32)
    w_eca = jax.random.normal(ke, (k_size,), dtype=jnp.float32) * 0.5   # Conv1d(1,1,k) weight
    w_sse = jax.random.normal(ks, (C,), dtype=jnp.float32) * 0.5        # Conv2d(C,1,1) weight

    out = jax.block_until_ready(eca_scse_pallas(x, w_eca, w_sse))
    ref = eca_scse_reference(x, w_eca, w_sse)
    assert out.shape == (B, C, H, W)
    # 1e-3 tolerance: the tiny in-kernel f32 MXU pass may round slightly
    # differently than the pure-VPU reference; observed diffs are ~1e-6.
    assert jnp.allclose(out, ref, atol=1e-3, rtol=1e-3), "fused path mismatch"

    # ---- exercise the two-pass tiled fallback (bt=2 packing, 2-step grid) --
    x2 = jax.random.normal(kx2, (4, C, H, W), dtype=jnp.float32)
    out2 = jax.block_until_ready(
        eca_scse_pallas(x2, w_eca, w_sse, force_two_pass=True))
    ref2 = eca_scse_reference(x2, w_eca, w_sse)
    assert jnp.allclose(out2, ref2, atol=1e-3, rtol=1e-3), "tiled path mismatch"

    print("KERNEL_OK")
</pallas_src>

<mosaic_0001>
module attributes {stable_mosaic.version = 11 : i64} {
  func.func @_fused_kernel(%arg0: i32, %arg1: memref<1x8x256xf32, #tpu.memory_space<vmem>>, %arg2: memref<8x8xf32, #tpu.memory_space<vmem>>, %arg3: memref<8x1xf32, #tpu.memory_space<vmem>>, %arg4: memref<1x8x256xf32, #tpu.memory_space<vmem>>) attributes {dimension_semantics = [#tpu.dimension_semantics<parallel>], iteration_bounds = array<i64: 2>, scalar_prefetch = 0 : i64, scratch_operands = 0 : i64, tpu.core_type = #tpu.core_type<tc>, window_params = [{transform_indices = @transform_0, window_bounds = array<i64: 1, 8, 256>}, {pipeline_mode = #tpu.pipeline_mode<synchronous>, transform_indices = @transform_1, window_bounds = array<i64: 8, 8>}, {pipeline_mode = #tpu.pipeline_mode<synchronous>, transform_indices = @transform_2, window_bounds = array<i64: 8, 1>}, {transform_indices = @transform_3, window_bounds = array<i64: 1, 8, 256>}]} {
    %c0 = arith.constant 0 : index
    %c0_0 = arith.constant 0 : index
    %c0_1 = arith.constant 0 : index
    %0 = vector.load %arg1[%c0, %c0_0, %c0_1] : memref<1x8x256xf32, #tpu.memory_space<vmem>>, vector<1x8x256xf32>
    %1 = vector.shape_cast %0 : vector<1x8x256xf32> to vector<8x256xf32>
    %cst = arith.constant dense<0.000000e+00> : vector<8xf32>
    %2 = vector.multi_reduction <add>, %1, %cst [1] : vector<8x256xf32> to vector<8xf32>
    %3 = vector.shape_cast %2 : vector<8xf32> to vector<8x1xf32>
    %cst_2 = arith.constant 2.560000e+02 : f32
    %4 = vector.broadcast %cst_2 : f32 to vector<8x1xf32>
    %5 = arith.divf %3, %4 : vector<8x1xf32>
    %c0_3 = arith.constant 0 : index
    %c0_4 = arith.constant 0 : index
    %6 = vector.load %arg2[%c0_3, %c0_4] : memref<8x8xf32, #tpu.memory_space<vmem>>, vector<8x8xf32>
    %cst_5 = arith.constant dense<0.000000e+00> : vector<8x1xf32>
    %7 = tpu.matmul %6, %5, %cst_5 {dimension_numbers = #tpu.dot_dimension_numbers<[1], [0], [0], [1], [0, 0, 1, 1], [], []>} : vector<8x8xf32>, vector<8x1xf32>, vector<8x1xf32> -> vector<8x1xf32>
    %8 = arith.negf %7 : vector<8x1xf32>
    %9 = math.exp %8 : vector<8x1xf32>
    %cst_6 = arith.constant 1.000000e+00 : f32
    %10 = vector.broadcast %cst_6 : f32 to vector<8x1xf32>
    %11 = arith.addf %10, %9 : vector<8x1xf32>
    %12 = arith.divf %10, %11 : vector<8x1xf32>
    %c0_7 = arith.constant 0 : index
    %c0_8 = arith.constant 0 : index
    %13 = vector.load %arg3[%c0_7, %c0_8] : memref<8x1xf32, #tpu.memory_space<vmem>>, vector<8x1xf32>
    %14 = vector.broadcast %13 : vector<8x1xf32> to vector<8x256xf32>
    %15 = arith.mulf %1, %14 : vector<8x256xf32>
    %cst_9 = arith.constant dense<0.000000e+00> : vector<256xf32>
    %16 = vector.multi_reduction <add>, %15, %cst_9 [0] : vector<8x256xf32> to vector<256xf32>
    %17 = vector.shape_cast %16 : vector<256xf32> to vector<1x256xf32>
    %18 = arith.negf %17 : vector<1x256xf32>
    %19 = math.exp %18 : vector<1x256xf32>
    %cst_10 = arith.constant 1.000000e+00 : f32
    %20 = vector.broadcast %cst_10 : f32 to vector<1x256xf32>
    %21 = arith.addf %20, %19 : vector<1x256xf32>
    %22 = arith.divf %20, %21 : vector<1x256xf32>
    %23 = vector.broadcast %12 : vector<8x1xf32> to vector<8x256xf32>
    %24 = vector.broadcast %22 : vector<1x256xf32> to vector<8x256xf32>
    %25 = arith.addf %23, %24 : vector<8x256xf32>
    %26 = arith.mulf %1, %25 : vector<8x256xf32>
    %c0_11 = arith.constant 0 : index
    %c0_12 = arith.constant 0 : index
    %c0_13 = arith.constant 0 : index
    %27 = vector.load %arg4[%c0_11, %c0_12, %c0_13] : memref<1x8x256xf32, #tpu.memory_space<vmem>>, vector<1x8x256xf32>
    %28 = vector.shape_cast %27 : vector<1x8x256xf32> to vector<8x256xf32>
    %29 = vector.shape_cast %26 : vector<8x256xf32> to vector<1x8x256xf32>
    tpu.vector_store %arg4[%c0_11, %c0_12, %c0_13], %29 {strides = array<i32>} : memref<1x8x256xf32, #tpu.memory_space<vmem>>, vector<1x8x256xf32>,
    return
  }
  func.func @transform_0(%arg0: i32) -> (i32, i32, i32) {
    %c0_i32 = arith.constant 0 : i32
    %c0_i32_0 = arith.constant 0 : i32
    %c0_i32_1 = arith.constant 0 : i32
    return %arg0, %c0_i32, %c0_i32_0 : i32, i32, i32
  }
  func.func @transform_1(%arg0: i32) -> (i32, i32) {
    %c0_i32 = arith.constant 0 : i32
    %c0_i32_0 = arith.constant 0 : i32
    %c0_i32_1 = arith.constant 0 : i32
    return %c0_i32, %c0_i32_0 : i32, i32
  }
  func.func @transform_2(%arg0: i32) -> (i32, i32) {
    %c0_i32 = arith.constant 0 : i32
    %c0_i32_0 = arith.constant 0 : i32
    %c0_i32_1 = arith.constant 0 : i32
    return %c0_i32, %c0_i32_0 : i32, i32
  }
  func.func @transform_3(%arg0: i32) -> (i32, i32, i32) {
    %c0_i32 = arith.constant 0 : i32
    %c0_i32_0 = arith.constant 0 : i32
    %c0_i32_1 = arith.constant 0 : i32
    return %arg0, %c0_i32, %c0_i32_0 : i32, i32, i32
  }
}

</mosaic_0001>

<bundles_post_ra>
// kernel: tpu_custom_call.1
= control target key start
LH: loop header
LB: loop body
LE: loop exit
PB: predicated region body
PF: predicated region fallthrough
CT: control target
= control target key end

     0   :  { %8 = vsyncpa [#allocation3], 0  ;;  %s787_s0 = inlined_call_operand.hbm [shape: f32[2,8,256], index: 0, kind: input, shape index: {}]   ;;  %s788_s1 = inlined_call_operand.vmem [shape: f32[8,8], index: 1, kind: input, shape index: {}]   ;;  %s789_s2 = inlined_call_operand.vmem [shape: f32[8,1], index: 2, kind: input, shape index: {}]   ;;  %s790_s3 = inlined_call_operand.hbm [shape: f32[2,8,256], index: 3, kind: output, shape index: {}]  }
   0x1   :  { %10 = vsyncpa [#allocation3 + $0x1], 0 }
   0x2   :  { %11 = vsyncpa [#allocation4], 0 }
   0x3   :  { %13 = vsyncpa [#allocation4 + $0x1], 0  ;;  %s616_s12 = smov 0   ;;  %s618_s13 = smov 0  }
   0x4   :  { %s620_s14 = smov 0   ;;  %s622_s15 = smov 0  }
   0x5 LB: > { %s637_s16 = sadd.s32 4294967295, %s589_s15   ;;  %s403_s17 = sadd.s32 4294967294, %s589_s15   ;;  %s589_s15 = sphi %s622_s15, %s805_s15   ;;  %s585_s14 = sphi %s620_s14, %s804_s14   ;;  %s581_s13 = sphi %s618_s13, %s803_s13   ;;  %s577_s12 = sphi %s616_s12, %s802_s12  }
   0x6   : > { %s641_s18 = sadd.s32 1, %s589_s15   ;;  %s26_s19 = sadd.s32 1, %s585_s14 }
   0x7   : > { %s23_s20 = ssub.s32 %s589_s15, %s641_s18  ;;  %p33_p0 = scmp.ne.s32.totalorder %s585_s14, %s581_s13 }
   0x8   : > { %p24_p1 = scmp.eq.s32.totalorder %s23_s20, 0  ;;  %p34_p2 = scmp.eq.s32.totalorder %s589_s15, 0 }
   0x9   : > { %p39_p3 = scmp.ne.s32.totalorder %s581_s13, %s577_s12  ;;  %p40_p4 = scmp.eq.s32.totalorder %s637_s16, 0 }
   0xa   : > { %s653_s21 = scalar_select %p24_p1, %s585_s14, %s26_s19  }
   0xb   : > { %p655_p5 = por %p34_p2, %p33_p0  ;;  %p659_p6 = por %p40_p4, %p39_p3 }
   0xc   : > { %p105_p7 = scmp.eq.s32.totalorder %s637_s16, 1  ;;  %p111_p8 = scmp.eq.s32.totalorder %s403_s17, 1 }
   0xd   : > { %p442_p10 = scmp.lt.s32.totalorder %s589_s15, 2  ;;  %s137_s26 = sand.u32 1, %s585_s14  }
   0xe   : > { %p666_p11 = por %p105_p7, %p33_p0  ;;  %p670_p12 = por %p111_p8, %p39_p3 }
   0xf   : > { %s421_s27 = sshll.u32 %s589_s15, 8  ;;  %s406_s28 = sshll.u32 %s137_s26, 4 }
  0x10   : > { %s794_s24 = scalar_select %p666_p11, 1, 0 }
  0x11   : > { %s795_s25 = scalar_select %p670_p12, 1, 0 }
  0x12   : > { %s679_s4 = scalar_lea.hbm %s787_s0, %s421_s27  ;;  %s141_s5 = scalar_lea.vmem [#allocation2], %s406_s28 }
  0x13   : > { %s149_s6 = sshll.u32 %s141_s5, 4  ;;  %p683_p13 = pnand %p442_p10, %p655_p5  ;;  %s687_s6 = int_to_ptr.vmem [resolvable:$true] %s149_s6 }
  0x14   : > { %s138_s8 = scalar_lea.sflag [#allocation3], %s137_s26  ;;  %s493_s9 = scalar_lea.hbm %s679_s4, 256 }
  0x15   : > { %p494_p2 = scmp.ne.s32.totalorder %s679_s4, %s493_s9  ;;  %p495_p3 = pneg %p683_p13 }
  0x16   : > { %s498_s17 = scalar_lea.hbm %s787_s0, 512  ;;  %p499_p5 = scmp.lt.u32.totalorder %s679_s4, %s787_s0 }
  0x17   : > { %p496_p4 = pnand %p495_p3, %p494_p2  ;;  %p500_p8 = scmp.lt.u32.totalorder %s498_s17, %s493_s9 }
  0x18   : > { %p502_p9 = scmp.lt.u32.totalorder %s493_s9, %s679_s4 }
  0x19   : > { %p497_p7 = pneg %p496_p4  ;;  %p501_p10 = por %p500_p8, %p499_p5 }
  0x1b   : > { %p503_p0 = por %p502_p9, %p501_p10 }
  0x1d   : > { %p504_p1 = pnand %p503_p0, %p497_p7 }
  0x1f   : > { %507 = shalt.err (!%p504_p1)
}
  0x20   : > { %s508_s22 = scalar_lea.vmem %s687_s6, 256  ;;  %s591_s26 = smov [#allocation2]  }
  0x21   : > { %p509_p2 = scmp.ne.s32.totalorder %s687_s6, %s508_s22  ;;  %s513_s27 = sshll.u32 %s591_s26, 4  ;;  %s514_s27 = int_to_ptr.vmem [resolvable:$false] %s513_s27 }
  0x22   : > { %s515_s28 = scalar_lea.vmem %s514_s27, 512  ;;  %p516_p11 = scmp.lt.s32.totalorder %s687_s6, %s514_s27 }
  0x23   : > { %p511_p4 = pnand %p509_p2, %p495_p3  ;;  %p517_p5 = scmp.lt.s32.totalorder %s515_s28, %s508_s22 }
  0x25   : > { %p512_p12 = pneg %p511_p4  ;;  %p518_p8 = por %p517_p5, %p516_p11 }
  0x27   : > { %p519_p9 = pnand %p518_p8, %p512_p12 }
  0x29   : > { %522 = shalt.err (!%p519_p9)
}
  0x2a   : > { %437 = dma.hbm_to_vmem [thread:$0]  (!%p683_p13), %s679_s4, 256, %s687_s6, %s138_s8  }
  0x2b   : > { %p797_p0 = scmp.lt.s32.totalorder %s589_s15, 3  ;;  %p798_p1 = scmp.ge.s32.totalorder %s589_s15, 1 }
  0x2d   : > { %p155_p3 = pnand %p798_p1, %p797_p0 }
  0x2e   : > { %s721_s29 = sand.u32 (!%p155_p3), 1, %s581_s13  }
  0x2f   : > { %158 = sbr.rel (%p155_p3) target bundleno = 587 (0x24b), region = 32  ;;  %s410_s30 = sshll.u32 (!%p155_p3), %s721_s29, 4 }
  0x30   : > { %s161_s5 = scalar_lea.sflag (!%p155_p3), [#allocation3], %s721_s29  ;;  %s164_s7 = scalar_lea.vmem (!%p155_p3), [#allocation2], %s410_s30 }
  0x36   : > { %568 = dma.done.wait (%p659_p6), %s161_s5, 256  }
  0x37   : > { %570 = vsyncadd (%p659_p6), %s161_s5, 4294967040  ;;  %v187_v0 = vld [vmem:[%s164_s7] sm:$0xff]  ;;  %v188_v1 = vld [vmem:[%s164_s7 + $0x8] sm:$0xff]  ;;  %v592_v3 = vmov 0.0   ;;  %vm593_vm0 = vmmov 0   ;;  %v594_v4 = vmov 0  }
  0x38   : > { %v189_v2 = vadd.f32 %v188_v1, %v187_v0  ;;  %425 = vmatprep.subr.mxu0 %v592_v3  ;;  %427 = vmatprep.mubr.msk.f32.mxu0 %vm593_vm0, %v592_v3  ;;  %v275_v5 = vld [vmem:[%s789_s2] sm:$0xff]  ;;  %vm195_vm1 = vcmask 64512   ;;  %s422_s9 = sshll.u32 %s637_s16, 8  ;;  %s186_s10 = scalar_lea.vmem [#allocation5], %s410_s30 }
  0x39   : > { %479 = vset.pattern.permute.xlu0 %v594_v4  ;;  %480 = vset.pattern.permute.xlu1 %v594_v4  ;;  %v194_v8 = vld [vmem:[%s788_s1] sm:$0xff]  ;;  %s333_s11 = sshll.u32 %s186_s10, 4  ;;  %s743_s20 = scalar_lea.hbm %s790_s3, %s422_s9  ;;  %s745_s11 = int_to_ptr.vmem [resolvable:$true] %s333_s11 }
  0x3a   : > { %190 = vadd.xlane.f32.xlu0 %v189_v2  ;;  %s319_s16 = scalar_lea.sflag [#allocation4], %s721_s29  ;;  %s523_s22 = scalar_lea.vmem %s745_s11, 256 }
  0x3b   : > { %p524_p6 = scmp.ne.s32.totalorder %s745_s11, %s523_s22  ;;  %p799_p11 = scmp.ne.s32.totalorder %s794_s24, 0 }
  0x3c   : > { %s595_s26 = smov [#allocation5]  }
  0x3d   : > { %p525_p12 = pnand %p524_p6, %p799_p11  ;;  %s527_s27 = sshll.u32 %s595_s26, 4  ;;  %s528_s27 = int_to_ptr.vmem [resolvable:$false] %s527_s27 }
  0x3e   : > { %s529_s28 = scalar_lea.vmem %s528_s27, 512  ;;  %p530_p7 = scmp.lt.s32.totalorder %s745_s11, %s528_s27 }
  0x3f   : > { %p526_p13 = pneg %p525_p12  ;;  %p531_p10 = scmp.lt.s32.totalorder %s529_s28, %s523_s22 }
  0x41   : > { %p532_p2 = por %p531_p10, %p530_p7 }
  0x43   : > { %p533_p4 = pnand %p532_p2, %p526_p13 }
  0x50   : > { %278 = vperm.xlu0 %479, %v275_v5  }
  0xc7   : > { %v191_v6 = vpop.xlane.xlu0 %190 }
  0xc8   : > { %v193_v7 = vmul.f32 0.00390625, %v191_v6 }
  0xca   : > { %426 = vmatpush3.msra.mxu0 %v193_v7 }
  0xcb   : > { %428 = vmatmul.mubr.msk.f32.vlgmr.msra.gmra.mrb[0].mxu0 %vm195_vm1, %v194_v8 }
  0xcf   : > { %v279_v15 = vpop.permute.xlu0 %278 }
  0xd0   : > { %v281_v16 = vmul.f32 %v279_v15, %v187_v0  ;;  %v282_v17 = vmul.f32 %v279_v15, %v188_v1 }
  0xd2   : > { %v283_v18 = vrot.slane %v281_v16, 4  ;;  %v289_v19 = vrot.slane %v282_v17, 4 }
  0xd4   : > { %v284_v20 = vadd.f32 %v283_v18, %v281_v16  ;;  %v290_v21 = vadd.f32 %v289_v19, %v282_v17 }
  0xd6   : > { %v285_v22 = vrot.slane %v284_v20, 2  ;;  %v291_v23 = vrot.slane %v290_v21, 2 }
  0xd8   : > { %v286_v24 = vadd.f32 %v285_v22, %v284_v20  ;;  %v292_v25 = vadd.f32 %v291_v23, %v290_v21 }
  0xda   : > { %v287_v26 = vrot.slane %v286_v24, 1  ;;  %v293_v27 = vrot.slane %v292_v25, 1 }
  0xdc   : > { %v288_v28 = vadd.f32 %v287_v26, %v286_v24  ;;  %v294_v29 = vadd.f32 %v293_v27, %v292_v25 }
  0xde   : > { %v414_v30 = vmul.f32 -1.442695, %v288_v28  ;;  %v415_v31 = vmul.f32 -1.442695, %v294_v29 }
 0x19e   : > { %v265_v9 = vpop.f32.mrb[0].mxu0 }
 0x19f   : > { %v413_v10 = vmul.f32 -1.442695, %v265_v9  ;;  %v429_v11 = vpop.f32.mrb[1].mxu0 }
 0x1a1   : > { %481 = vpow2.f32 %v413_v10 }
 0x1ab   : > { %v482_v12 = vpop.eup %481 }
 0x1ac   : > { %v272_v13 = vadd.f32 1.0, %v482_v12 }
 0x1ae   : > { %483 = vrcp.f32 %v272_v13 }
 0x1af   : > { %485 = vpow2.f32 %v414_v30 }
 0x1b0   : > { %487 = vpow2.f32 %v415_v31 }
 0x1b8   : > { %v484_v14 = vpop.eup %483 }
 0x1b9   : > { %309 = vperm.xlu1 %480, %v484_v14   ;;  %v486_v32 = vpop.eup %485 }
 0x1ba   : > { %v488_v33 = vpop.eup %487  ;;  %v301_v34 = vadd.f32 1.0, %v486_v32 }
 0x1bb   : > { %v302_v35 = vadd.f32 1.0, %v488_v33 }
 0x1bc   : > { %489 = vrcp.f32 %v301_v34 }
 0x1bd   : > { %491 = vrcp.f32 %v302_v35 }
 0x1c6   : > { %v490_v36 = vpop.eup %489 }
 0x1c7   : > { %v492_v37 = vpop.eup %491 }
 0x238   : > { %v310_v38 = vpop.permute.xlu1 %309 }
 0x239   : > { %v312_v39 = vadd.f32 %v490_v36, %v310_v38  ;;  %v313_v40 = vadd.f32 %v492_v37, %v310_v38 }
 0x23b   : > { %v314_v41 = vmul.f32 %v312_v39, %v187_v0  ;;  %v315_v42 = vmul.f32 %v313_v40, %v188_v1 }
 0x23d   : > { %316 = vst [vmem:[%s186_s10] sm:$0xff] %v314_v41  ;;  %317 = vst [vmem:[%s186_s10 + $0x8] sm:$0xff] %v315_v42 }
 0x23e   : > { %536 = shalt.err (!%p533_p4)
}
 0x23f   : > { %s537_s29 = scalar_lea.hbm %s743_s20, 256  ;;  %s541_s7 = scalar_lea.hbm %s790_s3, 512 }
 0x240   : > { %p538_p5 = scmp.ne.s32.totalorder %s743_s20, %s537_s29  ;;  %p542_p0 = scmp.lt.u32.totalorder %s743_s20, %s790_s3 }
 0x241   : > { %p543_p1 = scmp.lt.u32.totalorder %s541_s7, %s537_s29  ;;  %p545_p6 = scmp.lt.u32.totalorder %s537_s29, %s743_s20 }
 0x242   : > { %p539_p8 = pnand %p538_p5, %p799_p11 }
 0x243   : > { %p544_p3 = por %p543_p1, %p542_p0 }
 0x244   : > { %p540_p9 = pneg %p539_p8 }
 0x245   : > { %p546_p12 = por %p545_p6, %p544_p3 }
 0x247   : > { %p547_p13 = pnand %p546_p12, %p540_p9 }
 0x249   : > { %550 = shalt.err (!%p547_p13)
}
 0x24a   : > { %432 = dma.vmem_to_hbm [thread:$0]  (%p799_p11), %s745_s11, 256, %s743_s20, %s319_s16  }
 0x24b PF: > { %s345_s23 = sand.u32 1, %s577_s12   ;;  %p800_p7 = scmp.ne.s32.totalorder %s795_s25, 0 }
 0x24c   : > { %p801_p10 = scmp.ge.s32.totalorder %s589_s15, 2  ;;  %s346_s8 = scalar_lea.sflag [#allocation4], %s345_s23 }
 0x24e   : > { %p439_p2 = pnand %p801_p10, %p800_p7 }
 0x250   : > { %572 = dma.done.wait (!%p439_p2), %s346_s8, 256  }
 0x251   : > { %574 = vsyncadd (!%p439_p2), %s346_s8, 4294967040  ;;  %p16_p4 = scmp.ge.s32.totalorder %s641_s18, 4   ;;  %s802_s12 = smov %s581_s13 }
 0x252   : > { %s803_s13 = smov %s585_s14  ;;  %s804_s14 = smov %s653_s21 }
 0x253   : > { %s805_s15 = smov %s641_s18  ;;  %18 = sbr.rel (!%p16_p4) target bundleno = 5 (0x5), region = 77 }
 0x25a   :  { %351 = vsyncpa [#allocation3], 1 }
 0x25b   :  { %353 = vsyncpa [#allocation3 + $0x1], 1 }
 0x25c   :  { %354 = vsyncpa [#allocation4], 1 }
 0x25d   :  { %356 = vsyncpa [#allocation4 + $0x1], 1 }

</bundles_post_ra>
